<compile_context>
chip_gen: v7x
topology: tpu7x:2x2x1
jax: 0.10.0
libtpu: 0.0.40
codegen_flags: <defaults>
</compile_context>

<pallas_src>
import jax
import jax.numpy as jnp
from jax.experimental import pallas as pl
from jax.experimental.pallas import tpu as pltpu


def _value_net_kernel(x_ref, w1_ref, b1_ref, w2_ref, b2_ref, w3_ref, b3_ref,
                      out_ref):
    # x_ref : (tile, in)  streamed, f32
    # w1_ref: (H, in)   b1_ref: (H, 1)
    # w2_ref: (H, H)    b2_ref: (H, 1)
    # w3_ref: (1, H)    b3_ref: (1, 1)
    # out_ref: (1, tile)  -- lane-dense: batch on lanes
    x = x_ref[...].astype(w1_ref.dtype)

    # fc1 + ReLU, batch-on-lanes:  h1^T = W1 . x^T  -> (H, tile)
    # (same NT dimension numbers as the canonical flash-attention q.k^T dot;
    #  the only layout fixup in the whole kernel is this one small x transpose.)
    h1t = jax.lax.dot_general(
        w1_ref[...], x,
        dimension_numbers=(((1,), (1,)), ((), ())),
        preferred_element_type=jnp.float32)
    h1t = jnp.maximum(h1t + b1_ref[...], 0.0)                     # (H, tile) lane-dense

    # fc2 + ReLU:  h2^T = W2 . h1^T  -> (H, tile), MXU-natural, lane-dense
    h2t = jnp.dot(w2_ref[...], h1t, preferred_element_type=jnp.float32)
    h2t = jnp.maximum(h2t + b2_ref[...], 0.0)                     # (H, tile) lane-dense

    # fc3:  v = W3 . h2^T + b3  -> (1, tile); stored as a full-width lane-dense row
    v = jnp.dot(w3_ref[...], h2t, preferred_element_type=jnp.float32)
    out_ref[...] = (v + b3_ref[...]).astype(out_ref.dtype)


def _round_up(n, m):
    return ((n + m - 1) // m) * m


def _default_batch_tile(B):
    # Small / medium batches: one full tile (no padding, one grid step; per-step
    # overhead is irrelevant at this size).
    if B <= 1024:
        return B
    # Large batches: big 128-aligned tiles (cap 4096 rows -> per-grid-step
    # overhead fully amortised, per-tile VMEM still tiny) and at least 2 grid
    # steps so v7x's two TensorCores share the "parallel" batch axis.
    return min(4096, _round_up(pl.cdiv(B, 2), 128))


def value_network_forward(x, params, *, batch_tile=None):
    """Fused ValueNetwork forward. x: (B, input_dim) f32 -> (B, 1) f32."""
    w1, b1, w2, b2, w3, b3 = params          # PyTorch layout: W (out, in), b (out,)
    B, input_dim = x.shape
    hidden_dim = w1.shape[0]
    assert w1.shape == (hidden_dim, input_dim)
    assert w2.shape == (hidden_dim, hidden_dim)
    assert w3.shape == (1, hidden_dim)

    if batch_tile is None:
        batch_tile = _default_batch_tile(B)
    num_tiles = pl.cdiv(B, batch_tile)
    if num_tiles > 1:
        # multi-step grids need 128-aligned tiles for (8,128)-legal blocks and
        # unmasked lane-dense output stores
        assert batch_tile % 128 == 0, "batch_tile must be a multiple of 128"
    B_pad = num_tiles * batch_tile

    # Pad only when the tile does not divide the batch (rare; default heuristic
    # never pads for B <= 1024). x is otherwise streamed as-is: no wrapper cast,
    # no unconditional pad pass.
    x_in = x if B_pad == B else jnp.pad(x, ((0, B_pad - B), (0, 0)))
    # NOTE: x could additionally be staged lane-dense as a (B/8, 128) view and
    # unpacked in-kernel; skipped — at these dims the (tile, 16) block is small
    # and the dominant costs (step overhead, padded intermediates, extra HBM
    # passes) are already addressed.

    # Column-vector biases so they broadcast along the lane (batch) axis.
    b1_c = b1.reshape(hidden_dim, 1).astype(jnp.float32)
    b2_c = b2.reshape(hidden_dim, 1).astype(jnp.float32)
    b3_c = b3.reshape(1, 1).astype(jnp.float32)

    resident = lambda shape: pl.BlockSpec(shape, lambda i: (0, 0))

    out_row = pl.pallas_call(
        _value_net_kernel,
        out_shape=jax.ShapeDtypeStruct((1, B_pad), jnp.float32),
        grid_spec=pltpu.PrefetchScalarGridSpec(
            num_scalar_prefetch=0,
            grid=(num_tiles,),
            in_specs=[
                pl.BlockSpec((batch_tile, input_dim), lambda i: (i, 0)),   # x (streamed)
                resident((hidden_dim, input_dim)),                         # W1 (resident)
                resident((hidden_dim, 1)),                                 # b1
                resident((hidden_dim, hidden_dim)),                        # W2
                resident((hidden_dim, 1)),                                 # b2
                resident((1, hidden_dim)),                                 # W3
                resident((1, 1)),                                          # b3
            ],
            # lane-dense output row: batch on lanes, full-width stores
            out_specs=pl.BlockSpec((1, batch_tile), lambda i: (0, i)),
        ),
        compiler_params=pltpu.CompilerParams(
            dimension_semantics=("parallel",)),
    )(x_in, w1, b1_c, w2, b2_c, w3, b3_c)

    # Back to the PyTorch (B, 1) layout, dropping any batch padding.
    return out_row[0, :B].reshape(B, 1)


def init_params(key, input_dim, hidden_dim):
    """nn.Linear-style init: W (out, in), b (out,), U(-1/sqrt(fan_in), +1/sqrt(fan_in))."""
    ks = jax.random.split(key, 6)

    def linear(kw, kb, fan_in, fan_out):
        bound = 1.0 / float(fan_in) ** 0.5
        w = jax.random.uniform(kw, (fan_out, fan_in), jnp.float32, -bound, bound)
        b = jax.random.uniform(kb, (fan_out,), jnp.float32, -bound, bound)
        return w, b

    w1, b1 = linear(ks[0], ks[1], input_dim, hidden_dim)
    w2, b2 = linear(ks[2], ks[3], hidden_dim, hidden_dim)
    w3, b3 = linear(ks[4], ks[5], hidden_dim, 1)
    return (w1, b1, w2, b2, w3, b3)


def value_network_ref(x, params):
    """Pure-JAX f32 reference with nn.Linear convention (x @ W.T + b)."""
    w1, b1, w2, b2, w3, b3 = params
    hi = jax.lax.Precision.HIGHEST
    h = jnp.maximum(jnp.dot(x, w1.T, precision=hi) + b1, 0.0)
    h = jnp.maximum(jnp.dot(h, w2.T, precision=hi) + b2, 0.0)
    return jnp.dot(h, w3.T, precision=hi) + b3


if __name__ == "__main__":
    key = jax.random.PRNGKey(0)
    k_params, k_x1, k_x2 = jax.random.split(key, 3)

    input_dim, hidden_dim = 16, 32
    params = init_params(k_params, input_dim, hidden_dim)

    # 1) small batch: single grid step, batch mapped to output lanes, no padding.
    x_small = jax.random.normal(k_x1, (16, input_dim), jnp.float32)
    out_small = jax.block_until_ready(value_network_forward(x_small, params))
    ref_small = value_network_ref(x_small, params)
    assert out_small.shape == (16, 1), out_small.shape
    err_s = float(jnp.max(jnp.abs(out_small - ref_small)))
    assert jnp.allclose(out_small, ref_small, atol=5e-3, rtol=5e-3), (
        f"max abs err = {err_s}")

    # 2) non-multiple batch + explicit multi-step grid: exercises padding,
    #    lane-blocked output stores, and VMEM-resident weights across grid steps.
    x_big = jax.random.normal(k_x2, (200, input_dim), jnp.float32)
    out_big = jax.block_until_ready(
        value_network_forward(x_big, params, batch_tile=128))
    ref_big = value_network_ref(x_big, params)
    assert out_big.shape == (200, 1), out_big.shape
    err_b = float(jnp.max(jnp.abs(out_big - ref_big)))
    assert jnp.allclose(out_big, ref_big, atol=5e-3, rtol=5e-3), (
        f"max abs err = {err_b}")

    print("KERNEL_OK")
</pallas_src>

<mosaic_0001>
module attributes {stable_mosaic.version = 11 : i64} {
  func.func @_value_net_kernel(%arg0: i32, %arg1: memref<16x16xf32, #tpu.memory_space<vmem>>, %arg2: memref<32x16xf32, #tpu.memory_space<vmem>>, %arg3: memref<32x1xf32, #tpu.memory_space<vmem>>, %arg4: memref<32x32xf32, #tpu.memory_space<vmem>>, %arg5: memref<32x1xf32, #tpu.memory_space<vmem>>, %arg6: memref<1x32xf32, #tpu.memory_space<vmem>>, %arg7: memref<1x1xf32, #tpu.memory_space<vmem>>, %arg8: memref<1x16xf32, #tpu.memory_space<vmem>>) attributes {dimension_semantics = [#tpu.dimension_semantics<parallel>], iteration_bounds = array<i64: 1>, scalar_prefetch = 0 : i64, scratch_operands = 0 : i64, tpu.core_type = #tpu.core_type<tc>, window_params = [{transform_indices = @transform_0, window_bounds = array<i64: 16, 16>}, {pipeline_mode = #tpu.pipeline_mode<synchronous>, transform_indices = @transform_1, window_bounds = array<i64: 32, 16>}, {pipeline_mode = #tpu.pipeline_mode<synchronous>, transform_indices = @transform_2, window_bounds = array<i64: 32, 1>}, {pipeline_mode = #tpu.pipeline_mode<synchronous>, transform_indices = @transform_3, window_bounds = array<i64: 32, 32>}, {pipeline_mode = #tpu.pipeline_mode<synchronous>, transform_indices = @transform_4, window_bounds = array<i64: 32, 1>}, {pipeline_mode = #tpu.pipeline_mode<synchronous>, transform_indices = @transform_5, window_bounds = array<i64: 1, 32>}, {pipeline_mode = #tpu.pipeline_mode<synchronous>, transform_indices = @transform_6, window_bounds = array<i64: 1, 1>}, {transform_indices = @transform_7, window_bounds = array<i64: 1, 16>}]} {
    %c0 = arith.constant 0 : index
    %c0_0 = arith.constant 0 : index
    %0 = vector.load %arg1[%c0, %c0_0] : memref<16x16xf32, #tpu.memory_space<vmem>>, vector<16x16xf32>
    %c0_1 = arith.constant 0 : index
    %c0_2 = arith.constant 0 : index
    %1 = vector.load %arg2[%c0_1, %c0_2] : memref<32x16xf32, #tpu.memory_space<vmem>>, vector<32x16xf32>
    %cst = arith.constant dense<0.000000e+00> : vector<32x16xf32>
    %2 = tpu.matmul %1, %0, %cst {dimension_numbers = #tpu.dot_dimension_numbers<[1], [1], [0], [0], [0, 0, 1, 0], [], []>} : vector<32x16xf32>, vector<16x16xf32>, vector<32x16xf32> -> vector<32x16xf32>
    %c0_3 = arith.constant 0 : index
    %c0_4 = arith.constant 0 : index
    %3 = vector.load %arg3[%c0_3, %c0_4] : memref<32x1xf32, #tpu.memory_space<vmem>>, vector<32x1xf32>
    %4 = vector.broadcast %3 : vector<32x1xf32> to vector<32x16xf32>
    %5 = arith.addf %2, %4 : vector<32x16xf32>
    %cst_5 = arith.constant 0.000000e+00 : f32
    %6 = vector.broadcast %cst_5 : f32 to vector<32x16xf32>
    %7 = arith.maximumf %5, %6 : vector<32x16xf32>
    %c0_6 = arith.constant 0 : index
    %c0_7 = arith.constant 0 : index
    %8 = vector.load %arg4[%c0_6, %c0_7] : memref<32x32xf32, #tpu.memory_space<vmem>>, vector<32x32xf32>
    %cst_8 = arith.constant dense<0.000000e+00> : vector<32x16xf32>
    %9 = tpu.matmul %8, %7, %cst_8 {dimension_numbers = #tpu.dot_dimension_numbers<[1], [0], [0], [1], [0, 0, 1, 1], [], []>} : vector<32x32xf32>, vector<32x16xf32>, vector<32x16xf32> -> vector<32x16xf32>
    %c0_9 = arith.constant 0 : index
    %c0_10 = arith.constant 0 : index
    %10 = vector.load %arg5[%c0_9, %c0_10] : memref<32x1xf32, #tpu.memory_space<vmem>>, vector<32x1xf32>
    %11 = vector.broadcast %10 : vector<32x1xf32> to vector<32x16xf32>
    %12 = arith.addf %9, %11 : vector<32x16xf32>
    %cst_11 = arith.constant 0.000000e+00 : f32
    %13 = vector.broadcast %cst_11 : f32 to vector<32x16xf32>
    %14 = arith.maximumf %12, %13 : vector<32x16xf32>
    %c0_12 = arith.constant 0 : index
    %c0_13 = arith.constant 0 : index
    %15 = vector.load %arg6[%c0_12, %c0_13] : memref<1x32xf32, #tpu.memory_space<vmem>>, vector<1x32xf32>
    %cst_14 = arith.constant dense<0.000000e+00> : vector<1x16xf32>
    %16 = tpu.matmul %15, %14, %cst_14 {dimension_numbers = #tpu.dot_dimension_numbers<[1], [0], [0], [1], [0, 0, 1, 1], [], []>} : vector<1x32xf32>, vector<32x16xf32>, vector<1x16xf32> -> vector<1x16xf32>
    %c0_15 = arith.constant 0 : index
    %c0_16 = arith.constant 0 : index
    %17 = vector.load %arg7[%c0_15, %c0_16] : memref<1x1xf32, #tpu.memory_space<vmem>>, vector<1x1xf32>
    %18 = vector.broadcast %17 : vector<1x1xf32> to vector<1x16xf32>
    %19 = arith.addf %16, %18 : vector<1x16xf32>
    %c0_17 = arith.constant 0 : index
    %c0_18 = arith.constant 0 : index
    %20 = vector.load %arg8[%c0_17, %c0_18] : memref<1x16xf32, #tpu.memory_space<vmem>>, vector<1x16xf32>
    tpu.vector_store %arg8[%c0_17, %c0_18], %19 {strides = array<i32>} : memref<1x16xf32, #tpu.memory_space<vmem>>, vector<1x16xf32>,
    return
  }
  func.func @transform_0(%arg0: i32) -> (i32, i32) {
    %c0_i32 = arith.constant 0 : i32
    %c0_i32_0 = arith.constant 0 : i32
    return %arg0, %c0_i32 : i32, i32
  }
  func.func @transform_1(%arg0: i32) -> (i32, i32) {
    %c0_i32 = arith.constant 0 : i32
    %c0_i32_0 = arith.constant 0 : i32
    %c0_i32_1 = arith.constant 0 : i32
    return %c0_i32, %c0_i32_0 : i32, i32
  }
  func.func @transform_2(%arg0: i32) -> (i32, i32) {
    %c0_i32 = arith.constant 0 : i32
    %c0_i32_0 = arith.constant 0 : i32
    %c0_i32_1 = arith.constant 0 : i32
    return %c0_i32, %c0_i32_0 : i32, i32
  }
  func.func @transform_3(%arg0: i32) -> (i32, i32) {
    %c0_i32 = arith.constant 0 : i32
    %c0_i32_0 = arith.constant 0 : i32
    %c0_i32_1 = arith.constant 0 : i32
    return %c0_i32, %c0_i32_0 : i32, i32
  }
  func.func @transform_4(%arg0: i32) -> (i32, i32) {
    %c0_i32 = arith.constant 0 : i32
    %c0_i32_0 = arith.constant 0 : i32
    %c0_i32_1 = arith.constant 0 : i32
    return %c0_i32, %c0_i32_0 : i32, i32
  }
  func.func @transform_5(%arg0: i32) -> (i32, i32) {
    %c0_i32 = arith.constant 0 : i32
    %c0_i32_0 = arith.constant 0 : i32
    %c0_i32_1 = arith.constant 0 : i32
    return %c0_i32, %c0_i32_0 : i32, i32
  }
  func.func @transform_6(%arg0: i32) -> (i32, i32) {
    %c0_i32 = arith.constant 0 : i32
    %c0_i32_0 = arith.constant 0 : i32
    %c0_i32_1 = arith.constant 0 : i32
    return %c0_i32, %c0_i32_0 : i32, i32
  }
  func.func @transform_7(%arg0: i32) -> (i32, i32) {
    %c0_i32 = arith.constant 0 : i32
    %c0_i32_0 = arith.constant 0 : i32
    return %c0_i32, %arg0 : i32, i32
  }
}

</mosaic_0001>

<bundles_post_ra>
// kernel: tpu_custom_call.1
= control target key start
LH: loop header
LB: loop body
LE: loop exit
PB: predicated region body
PF: predicated region fallthrough
CT: control target
= control target key end

     0   :  { %s641_s0 = inlined_call_operand.vmem [shape: f32[16,16], index: 0, kind: input, shape index: {}]   ;;  %s642_s1 = inlined_call_operand.vmem [shape: f32[32,16], index: 1, kind: input, shape index: {}]   ;;  %s643_s2 = inlined_call_operand.vmem [shape: f32[32,1], index: 2, kind: input, shape index: {}]   ;;  %s644_s3 = inlined_call_operand.vmem [shape: f32[32,32], index: 3, kind: input, shape index: {}]   ;;  %s645_s4 = inlined_call_operand.vmem [shape: f32[32,1], index: 4, kind: input, shape index: {}]   ;;  %s646_s5 = inlined_call_operand.vmem [shape: f32[1,32], index: 5, kind: input, shape index: {}]   ;;  %s647_s6 = inlined_call_operand.<no memory space> [shape: f32[1,1], index: 6, kind: input, shape index: {}]   ;;  %s648_s7 = inlined_call_operand.hbm [shape: f32[1,16], index: 7, kind: output, shape index: {}]  }
   0x1   :  { %v12_v0 = vstv %s647_s6 }
   0x2   :  { %13 = vst [vmem:[#allocation2] sm:$0x1] %v12_v0 }
   0x3   :  { %v29_v1 = vld [vmem:[%s641_s0] sm:$0xff]  ;;  %v30_v2 = vld [vmem:[%s641_s0 + $0x8] sm:$0xff]  ;;  %vm59_vm0 = vcmask 130048   ;;  %v513_v5 = vmov 0   ;;  %v37_v7 = vld [vmem:[%s643_s2 + $0x10] sm:$0xff] }
   0x4   :  { %v31_v3 = vld [vmem:[%s642_s1] sm:$0xff]  ;;  %v462_v4 = vpack.c.bf16 %v30_v2, %v29_v1  ;;  %vm463_vm1 = vmpackc.low %vm59_vm0, %vm59_vm0  ;;  %487 = vset.pattern.permute.xlu0 %v513_v5  ;;  %488 = vset.pattern.permute.xlu1 %v513_v5  ;;  %v36_v8 = vld [vmem:[%s643_s2 + $0x8] sm:$0xff] }
   0x5   :  { %431 = vmatprep.mubr.msk.f32.mxu0 %vm59_vm0, %v31_v3  ;;  %v35_v6 = vld [vmem:[%s643_s2] sm:$0xff]  ;;  %51 = vperm.xlu1 %488, %v37_v7   ;;  %v38_v9 = vld [vmem:[%s643_s2 + $0x18] sm:$0xff] }
   0x6   :  { %464 = vmatprep.subr.msk.bf16.mxu0 %vm463_vm1, %v462_v4  ;;  %41 = vperm.xlu0 %487, %v35_v6  }
   0x7   :  { %467 = vmatpush3.bf16.xpose.msk.msra.mxu0 %vm463_vm1, %v462_v4 }
   0x8   :  { %14 = vsyncpa [#allocation4], 0  ;;  %v32_v10 = vld [vmem:[%s642_s1 + $0x8] sm:$0xff]  ;;  %v171_v11 = vld [vmem:[%s645_s4] sm:$0xff]  ;;  %vm195_vm2 = vcmask 261120   ;;  %v514_v40 = vmov 0.0|0.0   ;;  %v304_v61 = vlaneseq }
   0x9   :  { %56 = vperm.xlu1 %488, %v38_v9   ;;  %v33_v12 = vld [vmem:[%s642_s1 + $0x10] sm:$0xff]  ;;  %v172_v13 = vld [vmem:[%s645_s4 + $0x8] sm:$0xff]  ;;  %v34_v14 = vld [vmem:[%s642_s1 + $0x18] sm:$0xff]  ;;  %476 = vmatprep.subr.bf16.mxu0 %v514_v40  ;;  %vm515_vm3 = vmmov 0   ;;  %v516_v41 = vmov 0.0   ;;  %s517_s10 = smov [#allocation3]  }
   0xa   :  { %46 = vperm.xlu0 %487, %v36_v8   ;;  %v173_v15 = vld [vmem:[%s645_s4 + $0x10] sm:$0xff]  ;;  %v174_v16 = vld [vmem:[%s645_s4 + $0x18] sm:$0xff]  ;;  %v298_v17 = vld [vmem:[#allocation2] sm:$0x1]  ;;  %v305_v62 = vshrl.u32 %v304_v61, 7  ;;  %s389_s11 = sshll.u32 %s517_s10, 4  ;;  %s390_s11 = int_to_ptr.vmem [resolvable:$true] %s389_s11 }
   0xb   :  { %v167_v18 = vld [vmem:[%s644_s3] sm:$0xff]  ;;  %v168_v37 = vld [vmem:[%s644_s3 + $0x8] sm:$0xff]  ;;  %v169_v38 = vld [vmem:[%s644_s3 + $0x10] sm:$0xff]  ;;  %vm381_vm4 = vcmask 122880   ;;  %s489_s12 = scalar_lea.vmem %s390_s11, 16  ;;  %s493_s13 = scalar_lea.vmem %s390_s11, 32 }
   0xc   :  { %445 = vmatprep.mubr.msk.f32.mxu1 %vm195_vm2, %v167_v18  ;;  %v170_v39 = vld [vmem:[%s644_s3 + $0x18] sm:$0xff]  ;;  %v297_v60 = vld [vmem:[%s646_s5] sm:$0x1]  ;;  %v306_v63 = vsub.s32 0, %v305_v62  ;;  %p490_p0 = scmp.ne.s32.totalorder %s390_s11, %s489_s12  ;;  %p494_p1 = scmp.lt.s32.totalorder %s390_s11, %s390_s11 }
   0xd   :  { %182 = vperm.xlu1 %488, %v172_v13   ;;  %p495_p2 = scmp.lt.s32.totalorder %s493_s13, %s489_s12 }
   0xe   :  { %432 = vmatmul.mubr.msk.f32.vlgmr.msra.gmra.mrb[0].mxu0 %vm59_vm0, %v32_v10  ;;  %177 = vperm.xlu0 %487, %v171_v11  }
   0xf   :  { %434 = vmatprep.mubr.msk.f32.mxu0 %vm59_vm0, %v33_v12  ;;  %p496_p3 = por %p495_p2, %p494_p1 }
  0x11   :  { %192 = vperm.xlu1 %488, %v174_v16   ;;  %p497_p4 = pnand %p496_p3, %p490_p0 }
  0x12   :  { %435 = vmatmul.mubr.msk.f32.gmra.mrb[2].mxu0 %vm59_vm0, %v34_v14  ;;  %187 = vperm.xlu0 %487, %v173_v15  }
  0x13   :  { %459 = vmatprep.mubr.msk.f32.mxu0 %vm515_vm3, %v516_v41 }
  0x16   :  { %301 = vperm.xlu0 %487, %v298_v17  }
  0x84   :  { %v52_v20 = vpop.permute.xlu1 %51 }
  0x85   :  { %v42_v19 = vpop.permute.xlu0 %41 }
  0x88   :  { %v57_v27 = vpop.permute.xlu1 %56 }
  0x89   :  { %v47_v21 = vpop.permute.xlu0 %46 }
  0x8c   :  { %v183_v42 = vpop.permute.xlu1 %182 }
  0x8d   :  { %v178_v43 = vpop.permute.xlu0 %177 }
  0x90   :  { %v193_v49 = vpop.permute.xlu1 %192 }
  0x91   :  { %v188_v52 = vpop.permute.xlu0 %187 }
  0x95   :  { %v302_v0 = vpop.permute.xlu0 %301 }
  0x96   :  { %v307_v1 = vrot.slane %v302_v0, %v306_v63 }
  0xe1   :  { %v433_v22 = vpop.f32.mrb[0].mxu0 }
  0xe2   :  { %v150_v23 = vadd.f32 %v433_v22, %v47_v21  ;;  %v144_v24 = vpop.f32.mrb[1].mxu0 }
  0xe3   :  { %v145_v25 = vadd.f32 %v144_v24, %v42_v19 }
  0xe4   :  { %v164_v26 = vmax.f32 %v150_v23, 0.0 }
  0xe5   :  { %v163_v28 = vmax.f32 %v145_v25, 0.0  ;;  %v436_v29 = vpop.f32.mrb[2].mxu0 }
  0xe6   :  { %v160_v30 = vadd.f32 %v436_v29, %v57_v27  ;;  %v154_v31 = vpop.f32.mrb[3].mxu0 }
  0xe7   :  { %v155_v32 = vadd.f32 %v154_v31, %v52_v20  ;;  %v468_v33 = vpack.c.bf16 %v164_v26, %v163_v28 }
  0xe8   :  { %v166_v34 = vmax.f32 %v160_v30, 0.0 }
  0xe9   :  { %v165_v35 = vmax.f32 %v155_v32, 0.0  ;;  %469 = vmatprep.subr.bf16.mxu1 %v468_v33 }
  0xea   :  { %471 = vmatpush3.bf16.msra.mxu1 %v468_v33 }
  0xeb   :  { %v472_v36 = vpack.c.bf16 %v166_v34, %v165_v35 }
  0xed   :  { %473 = vmatprep.subr.bf16.mxu1 %v472_v36 }
  0xee   :  { %475 = vmatpush3.bf16.msra.mxu1 %v472_v36 }
  0xf1   :  { %446 = vmatmul.mubr.msk.f32.vlgmr.msra.gmra.mrb[0].mxu1 %vm195_vm2, %v168_v37 }
  0xf2   :  { %448 = vmatprep.mubr.msk.f32.mxu1 %vm195_vm2, %v169_v38 }
  0xf5   :  { %449 = vmatmul.mubr.msk.f32.gmra.mrb[2].mxu1 %vm195_vm2, %v170_v39 }
 0x1c4   :  { %v447_v44 = vpop.f32.mrb[0].mxu1 }
 0x1c5   :  { %v280_v45 = vadd.f32 %v447_v44, %v183_v42  ;;  %v274_v46 = vpop.f32.mrb[1].mxu1 }
 0x1c6   :  { %v275_v47 = vadd.f32 %v274_v46, %v178_v43 }
 0x1c7   :  { %v294_v48 = vmax.f32 %v280_v45, 0.0 }
 0x1c8   :  { %v293_v50 = vmax.f32 %v275_v47, 0.0  ;;  %v450_v51 = vpop.f32.mrb[2].mxu1 }
 0x1c9   :  { %v290_v53 = vadd.f32 %v450_v51, %v193_v49  ;;  %v284_v54 = vpop.f32.mrb[3].mxu1 }
 0x1ca   :  { %v477_v55 = vpack.c.bf16 %v294_v48, %v293_v50  ;;  %v285_v56 = vadd.f32 %v284_v54, %v188_v52 }
 0x1cb   :  { %v296_v57 = vmax.f32 %v290_v53, 0.0 }
 0x1cc   :  { %v295_v58 = vmax.f32 %v285_v56, 0.0  ;;  %478 = vmatpush3.bf16.msra.mxu0 %v477_v55 }
 0x1cd   :  { %479 = vmatprep.subr.bf16.mxu0 %v514_v40 }
 0x1ce   :  { %v480_v59 = vpack.c.bf16 %v296_v57, %v295_v58 }
 0x1d0   :  { %481 = vmatpush3.bf16.msra.mxu0 %v480_v59 }
 0x1d3   :  { %460 = vmatmul.mubr.msk.f32.vlgmr.msra.gmra.mrb[4].mxu0 %vm195_vm2, %v297_v60 }
 0x2a6   :  { %v377_v2 = vpop.f32.mrb[4].mxu0 }
 0x2a7   :  { %v378_v3 = vadd.f32 %v377_v2, %v307_v1  ;;  %v461_v4 = vpop.f32.mrb[5].mxu0 }
 0x2a9   :  { %382 = vst.msk [vmem:[#allocation3] sm:$0x1] %vm381_vm4, %v378_v3 }
 0x2aa   :  { %500 = shalt.err (!%p497_p4)
}
 0x2ab   :  { %s501_s15 = scalar_lea.hbm %s648_s7, 16 }
 0x2ac   :  { %p502_p5 = scmp.ne.s32.totalorder %s648_s7, %s501_s15  ;;  %p505_p6 = scmp.lt.u32.totalorder %s501_s15, %s648_s7 }
 0x2ae   :  { %p507_p7 = pnand %p505_p6, %p502_p5 }
 0x2b0   :  { %510 = shalt.err (!%p507_p7)
}
 0x2b1   :  { %392 = dma.vmem_to_hbm [thread:$0]  %s390_s11, 16, %s648_s7, [#allocation4]  }
 0x2b2   :  { %511 = dma.done.wait [#allocation4], 16  }
 0x2b3   :  { %512 = vsyncadd [#allocation4], 4294967280 }
 0x2b4   :  { %396 = vsyncpa [#allocation4], 1 }

</bundles_post_ra>
